<compile_context>
chip_gen: v7x
topology: tpu7x:2x2x1
jax: 0.10.0
libtpu: 0.0.40
codegen_flags: <defaults>
</compile_context>

<pallas_src>
import math

import jax
import jax.numpy as jnp
from jax import lax
from jax.experimental import pallas as pl
from jax.experimental.pallas import tpu as pltpu


_SQRT_HALF = 1.0 / math.sqrt(2.0)


def _round_up(x, m):
    return ((x + m - 1) // m) * m


def _pick_tile_f(F, target):
    """Largest multiple of 128 that divides F and is <= target (else full F)."""
    if F <= target or F % 128 != 0:
        return F
    best = 128
    t = 128
    while t <= target:
        if F % t == 0:
            best = t
        t += 128
    return best


def _grouped_mlp_kernel(gids_ref, x_ref, w1_ref, w2_ref, out_ref, acc_ref):
    """grid = (token_tile t, ffn_chunk k).  One token tile == one expert."""
    k = pl.program_id(1)

    @pl.when(k == 0)
    def _():
        acc_ref[...] = jnp.zeros_like(acc_ref)

    x = x_ref[...]          # [tT, H]
    w1 = w1_ref[...]        # [tF, H]  (expert dim squeezed away)
    w2 = w2_ref[...]        # [H, tF]

    # Linear1 chunk: contract H (dim 1 of both operands) -> [tT, tF] on the MXU.
    h = lax.dot_general(x, w1, (((1,), (1,)), ((), ())),
                        preferred_element_type=jnp.float32)

    # Exact erf-based GELU in f32 (matches torch.nn.functional.gelu default).
    a = 0.5 * h * (1.0 + lax.erf(h * _SQRT_HALF))

    # Linear2 chunk: contract tF (dim 1 of both operands) -> [tT, H]; f32 acc.
    acc_ref[...] += lax.dot_general(a.astype(w2.dtype), w2,
                                    (((1,), (1,)), ((), ())),
                                    preferred_element_type=jnp.float32)

    @pl.when(k == pl.num_programs(1) - 1)
    def _():
        out_ref[...] = acc_ref[...].astype(out_ref.dtype)


def sequential_mlp(permuted_hidden, tokens_per_expert, w1, w2, *,
                   tile_t=256, tile_f=512, compute_dtype=None):
    """
    permuted_hidden:   [T, H]
    tokens_per_expert: [E] int (sums to <= T)
    w1:                [E, F, H]   (Linear1 weights, per expert)
    w2:                [E, H, F]   (Linear2 weights, per expert)
    returns output_local: [T, H] in permuted_hidden.dtype
    """
    T, H = permuted_hidden.shape
    E, F, H2 = w1.shape
    assert H2 == H and w2.shape == (E, H, F)

    if compute_dtype is None:
        compute_dtype = permuted_hidden.dtype
    out_dtype = permuted_hidden.dtype

    # ---- tile sizes (sublane/lane friendly, adapted to small shapes) ----
    tile_t = max(8, (min(tile_t, _round_up(T, 8)) // 8) * 8)
    tile_f = _pick_tile_f(F, tile_f)
    n_k = F // tile_f

    # ---- pad each expert's token range to a multiple of tile_t so every
    #      token tile maps to exactly one expert (boundaries off the hot path).
    counts = tokens_per_expert.astype(jnp.int32)
    offs = jnp.concatenate([jnp.zeros((1,), jnp.int32),
                            jnp.cumsum(counts).astype(jnp.int32)])
    padded_counts = ((counts + tile_t - 1) // tile_t) * tile_t
    padded_offs = jnp.concatenate([jnp.zeros((1,), jnp.int32),
                                   jnp.cumsum(padded_counts).astype(jnp.int32)])
    total = offs[E]

    num_tiles = pl.cdiv(T, tile_t) + E          # static worst case
    P = num_tiles * tile_t

    rows = jnp.arange(T, dtype=jnp.int32)
    e_of_row = jnp.clip(jnp.searchsorted(offs, rows, side="right") - 1,
                        0, E).astype(jnp.int32)
    new_rows = padded_offs[e_of_row] + (rows - offs[e_of_row])

    x_padded = jnp.zeros((P, H), dtype=compute_dtype)
    x_padded = x_padded.at[new_rows].set(permuted_hidden.astype(compute_dtype))

    tile_starts = jnp.arange(num_tiles, dtype=jnp.int32) * tile_t
    gids = jnp.searchsorted(padded_offs, tile_starts, side="right") - 1
    gids = jnp.clip(gids, 0, E - 1).astype(jnp.int32)

    w1c = w1.astype(compute_dtype)
    w2c = w2.astype(compute_dtype)

    # ---- VMEM budget (cap at v7x's 64 MiB) + advisory cost estimate ----
    cbytes = jnp.dtype(compute_dtype).itemsize
    obytes = jnp.dtype(out_dtype).itemsize
    vmem_needed = (2 * tile_t * H * cbytes        # x tile, double-buffered
                   + 2 * tile_f * H * cbytes      # w1 chunk
                   + 2 * H * tile_f * cbytes      # w2 chunk
                   + 2 * tile_t * H * obytes      # out tile
                   + tile_t * H * 4)              # f32 accumulator scratch
    vmem_limit = int(min(64 * 2**20, max(32 * 2**20, vmem_needed + (8 << 20))))

    cost = pl.CostEstimate(
        flops=4 * T * H * F,
        transcendentals=T * F,
        bytes_accessed=T * H * cbytes + 2 * E * F * H * cbytes + T * H * obytes,
    )

    grid_spec = pltpu.PrefetchScalarGridSpec(
        num_scalar_prefetch=1,
        grid=(num_tiles, n_k),
        in_specs=[
            # token tile (constant over k -> fetched once per tile)
            pl.BlockSpec((tile_t, H), lambda t, k, gids: (t, 0)),
            # expert-selected W1 ffn-chunk: [tF, H]
            pl.BlockSpec((pl.Squeezed(), tile_f, H),
                         lambda t, k, gids: (gids[t], k, 0)),
            # expert-selected W2 ffn-chunk: [H, tF]
            pl.BlockSpec((pl.Squeezed(), H, tile_f),
                         lambda t, k, gids: (gids[t], 0, k)),
        ],
        out_specs=pl.BlockSpec((tile_t, H), lambda t, k, gids: (t, 0)),
        scratch_shapes=[pltpu.VMEM((tile_t, H), jnp.float32)],
    )

    out_padded = pl.pallas_call(
        _grouped_mlp_kernel,
        out_shape=jax.ShapeDtypeStruct((P, H), out_dtype),
        grid_spec=grid_spec,
        compiler_params=pltpu.CompilerParams(
            dimension_semantics=("parallel", "arbitrary"),
            vmem_limit_bytes=vmem_limit,
        ),
        cost_estimate=cost,
    )(gids, x_padded, w1c, w2c)

    # Un-pad: gather each original row's result; rows past the routed total stay 0.
    gathered = out_padded[new_rows]
    return jnp.where((rows < total)[:, None], gathered, 0).astype(out_dtype)


def sequential_mlp_reference(permuted_hidden, tokens_per_expert, w1, w2):
    """Pure-JAX reference mirroring the PyTorch forward loop (f32)."""
    import numpy as np
    out = jnp.zeros_like(permuted_hidden)
    counts = np.asarray(jax.device_get(tokens_per_expert))
    offs = np.concatenate([[0], np.cumsum(counts)]).astype(np.int64)
    for e in range(w1.shape[0]):
        s, t = int(offs[e]), int(offs[e + 1])
        x = permuted_hidden[s:t]
        h = x @ w1[e].T
        a = 0.5 * h * (1.0 + lax.erf(h * _SQRT_HALF))
        y = a @ w2[e].T
        out = out.at[s:t].set(y)
    return out


if __name__ == "__main__":
    # Small synthetic config (Megatron-ish): tp=1, no GLU, gelu activation.
    num_local_experts = 2
    hidden_size = 128
    ffn_hidden = 256              # per-partition ffn size (tp = 1)
    total_tokens = 16
    tokens_per_expert = jnp.array([6, 10], dtype=jnp.int32)

    key = jax.random.PRNGKey(0)
    kx, kw1, kw2 = jax.random.split(key, 3)

    # torch.rand -> uniform [0, 1); deterministic via PRNGKey(0).
    x = jax.random.uniform(kx, (total_tokens, hidden_size), dtype=jnp.float32)
    w1 = jax.random.uniform(
        kw1, (num_local_experts, ffn_hidden, hidden_size), dtype=jnp.float32)
    w2 = jax.random.uniform(
        kw2, (num_local_experts, hidden_size, ffn_hidden), dtype=jnp.float32)

    ref = sequential_mlp_reference(x, tokens_per_expert, w1, w2)

    # f32 MXU path: strict check vs reference.
    out_f32 = jax.block_until_ready(sequential_mlp(x, tokens_per_expert, w1, w2))
    assert jnp.allclose(out_f32, ref, rtol=1e-4, atol=1e-4), "f32 mismatch vs reference"

    # bf16 MXU path (perf recommendation): loose relative-error check.
    out_bf16 = jax.block_until_ready(
        sequential_mlp(x, tokens_per_expert, w1, w2, compute_dtype=jnp.bfloat16))
    rel_err = jnp.max(jnp.abs(out_bf16 - ref)) / (jnp.max(jnp.abs(ref)) + 1e-6)
    assert float(rel_err) < 3e-2, f"bf16 rel err too large: {float(rel_err)}"

    print("KERNEL_OK")
</pallas_src>

<mosaic_0001>
module attributes {stable_mosaic.version = 11 : i64} {
  func.func @_grouped_mlp_kernel(%arg0: i32, %arg1: i32, %arg2: memref<3xi32, #tpu.memory_space<smem>>, %arg3: memref<16x128xf32, #tpu.memory_space<vmem>>, %arg4: memref<1x256x128xf32, #tpu.memory_space<vmem>>, %arg5: memref<1x128x256xf32, #tpu.memory_space<vmem>>, %arg6: memref<16x128xf32, #tpu.memory_space<vmem>>, %arg7: memref<16x128xf32, #tpu.memory_space<vmem>>) attributes {dimension_semantics = [#tpu.dimension_semantics<parallel>, #tpu.dimension_semantics<arbitrary>], iteration_bounds = array<i64: 3, 1>, scalar_prefetch = 1 : i64, scratch_operands = 1 : i64, tpu.core_type = #tpu.core_type<tc>, window_params = [{transform_indices = @transform_0, window_bounds = array<i64: 16, 128>}, {transform_indices = @transform_1, window_bounds = array<i64: 1, 256, 128>}, {transform_indices = @transform_2, window_bounds = array<i64: 1, 128, 256>}, {transform_indices = @transform_3, window_bounds = array<i64: 16, 128>}]} {
    %c0_i32 = arith.constant 0 : i32
    %0 = arith.cmpi eq, %arg1, %c0_i32 : i32
    %1 = arith.extui %0 : i1 to i32
    %c0_i32_0 = arith.constant 0 : i32
    %2 = arith.cmpi ne, %1, %c0_i32_0 : i32
    scf.if %2 {
      %cst_18 = arith.constant 0.000000e+00 : f32
      %24 = vector.broadcast %cst_18 : f32 to vector<16x128xf32>
      %c0_19 = arith.constant 0 : index
      %c0_20 = arith.constant 0 : index
      %25 = vector.load %arg7[%c0_19, %c0_20] : memref<16x128xf32, #tpu.memory_space<vmem>>, vector<16x128xf32>
      tpu.vector_store %arg7[%c0_19, %c0_20], %24 {strides = array<i32>} : memref<16x128xf32, #tpu.memory_space<vmem>>, vector<16x128xf32>,
    } else {
    }
    %c0 = arith.constant 0 : index
    %c0_1 = arith.constant 0 : index
    %3 = vector.load %arg3[%c0, %c0_1] : memref<16x128xf32, #tpu.memory_space<vmem>>, vector<16x128xf32>
    %c0_2 = arith.constant 0 : index
    %c0_3 = arith.constant 0 : index
    %c0_4 = arith.constant 0 : index
    %4 = vector.load %arg4[%c0_2, %c0_3, %c0_4] : memref<1x256x128xf32, #tpu.memory_space<vmem>>, vector<1x256x128xf32>
    %5 = vector.shape_cast %4 : vector<1x256x128xf32> to vector<256x128xf32>
    %c0_5 = arith.constant 0 : index
    %c0_6 = arith.constant 0 : index
    %c0_7 = arith.constant 0 : index
    %6 = vector.load %arg5[%c0_5, %c0_6, %c0_7] : memref<1x128x256xf32, #tpu.memory_space<vmem>>, vector<1x128x256xf32>
    %7 = vector.shape_cast %6 : vector<1x128x256xf32> to vector<128x256xf32>
    %cst = arith.constant dense<0.000000e+00> : vector<16x256xf32>
    %8 = tpu.matmul %3, %5, %cst {dimension_numbers = #tpu.dot_dimension_numbers<[1], [1], [0], [0], [0, 0, 1, 0], [], []>} : vector<16x128xf32>, vector<256x128xf32>, vector<16x256xf32> -> vector<16x256xf32>
    %cst_8 = arith.constant 5.000000e-01 : f32
    %9 = vector.broadcast %cst_8 : f32 to vector<16x256xf32>
    %10 = arith.mulf %9, %8 : vector<16x256xf32>
    %cst_9 = arith.constant 0.707106769 : f32
    %11 = vector.broadcast %cst_9 : f32 to vector<16x256xf32>
    %12 = arith.mulf %8, %11 : vector<16x256xf32>
    %13 = math.erf %12 : vector<16x256xf32>
    %cst_10 = arith.constant 1.000000e+00 : f32
    %14 = vector.broadcast %cst_10 : f32 to vector<16x256xf32>
    %15 = arith.addf %14, %13 : vector<16x256xf32>
    %16 = arith.mulf %10, %15 : vector<16x256xf32>
    %c0_11 = arith.constant 0 : index
    %c0_12 = arith.constant 0 : index
    %17 = vector.load %arg7[%c0_11, %c0_12] : memref<16x128xf32, #tpu.memory_space<vmem>>, vector<16x128xf32>
    %cst_13 = arith.constant dense<0.000000e+00> : vector<16x128xf32>
    %18 = tpu.matmul %16, %7, %cst_13 {dimension_numbers = #tpu.dot_dimension_numbers<[1], [1], [0], [0], [0, 0, 1, 0], [], []>} : vector<16x256xf32>, vector<128x256xf32>, vector<16x128xf32> -> vector<16x128xf32>
    %19 = arith.addf %17, %18 : vector<16x128xf32>
    %c0_14 = arith.constant 0 : index
    %c0_15 = arith.constant 0 : index
    %20 = vector.load %arg7[%c0_14, %c0_15] : memref<16x128xf32, #tpu.memory_space<vmem>>, vector<16x128xf32>
    tpu.vector_store %arg7[%c0_14, %c0_15], %19 {strides = array<i32>} : memref<16x128xf32, #tpu.memory_space<vmem>>, vector<16x128xf32>,
    %c0_i32_16 = arith.constant 0 : i32
    %21 = arith.cmpi eq, %arg1, %c0_i32_16 : i32
    %22 = arith.extui %21 : i1 to i32
    %c0_i32_17 = arith.constant 0 : i32
    %23 = arith.cmpi ne, %22, %c0_i32_17 : i32
    scf.if %23 {
      %c0_18 = arith.constant 0 : index
      %c0_19 = arith.constant 0 : index
      %24 = vector.load %arg7[%c0_18, %c0_19] : memref<16x128xf32, #tpu.memory_space<vmem>>, vector<16x128xf32>
      %c0_20 = arith.constant 0 : index
      %c0_21 = arith.constant 0 : index
      %25 = vector.load %arg6[%c0_20, %c0_21] : memref<16x128xf32, #tpu.memory_space<vmem>>, vector<16x128xf32>
      tpu.vector_store %arg6[%c0_20, %c0_21], %24 {strides = array<i32>} : memref<16x128xf32, #tpu.memory_space<vmem>>, vector<16x128xf32>,
    } else {
    }
    return
  }
  func.func @transform_0(%arg0: i32, %arg1: i32, %arg2: memref<3xi32, #tpu.memory_space<smem>>) -> (i32, i32) {
    %c0_i32 = arith.constant 0 : i32
    %c0_i32_0 = arith.constant 0 : i32
    return %arg0, %c0_i32 : i32, i32
  }
  func.func @transform_1(%arg0: i32, %arg1: i32, %arg2: memref<3xi32, #tpu.memory_space<smem>>) -> (i32, i32, i32) {
    %0 = arith.index_cast %arg0 : i32 to index
    %1 = memref.load %arg2[%0] : memref<3xi32, #tpu.memory_space<smem>>
    %c0_i32 = arith.constant 0 : i32
    %c0_i32_0 = arith.constant 0 : i32
    return %1, %arg1, %c0_i32 : i32, i32, i32
  }
  func.func @transform_2(%arg0: i32, %arg1: i32, %arg2: memref<3xi32, #tpu.memory_space<smem>>) -> (i32, i32, i32) {
    %0 = arith.index_cast %arg0 : i32 to index
    %1 = memref.load %arg2[%0] : memref<3xi32, #tpu.memory_space<smem>>
    %c0_i32 = arith.constant 0 : i32
    %c0_i32_0 = arith.constant 0 : i32
    return %1, %c0_i32, %arg1 : i32, i32, i32
  }
  func.func @transform_3(%arg0: i32, %arg1: i32, %arg2: memref<3xi32, #tpu.memory_space<smem>>) -> (i32, i32) {
    %c0_i32 = arith.constant 0 : i32
    %c0_i32_0 = arith.constant 0 : i32
    return %arg0, %c0_i32 : i32, i32
  }
}

</mosaic_0001>

<bundles_post_ra>
// kernel: tpu_custom_call.1
= control target key start
LH: loop header
LB: loop body
LE: loop exit
PB: predicated region body
PF: predicated region fallthrough
CT: control target
= control target key end

     0   :  { %s1728_s0 = inlined_call_operand.hbm [shape: s32[3], index: 0, kind: input, shape index: {}]   ;;  %s1729_s1 = inlined_call_operand.hbm [shape: f32[48,128], index: 1, kind: input, shape index: {}]   ;;  %s1730_s2 = inlined_call_operand.hbm [shape: f32[2,256,128], index: 2, kind: input, shape index: {}]   ;;  %s1731_s3 = inlined_call_operand.hbm [shape: f32[2,128,256], index: 3, kind: input, shape index: {}]   ;;  %s1732_s4 = inlined_call_operand.hbm [shape: f32[48,128], index: 4, kind: output, shape index: {}]  }
   0x1   :  { %1746 = sst [smem:[#allocation27_spill]] %s1730_s2  ;;  %s974_s17 = scalar_lea.hbm %s1728_s0, 16 }
   0x2   :  { %p975_p0 = scmp.ne.s32.totalorder %s1728_s0, %s974_s17  ;;  %p978_p1 = scmp.lt.u32.totalorder %s974_s17, %s1728_s0 }
   0x4   :  { %p980_p2 = pnand %p978_p1, %p975_p0 }
   0x6   :  { %983 = shalt.err (!%p980_p2)  }
   0x7   :  { %s1216_s22 = smov [#allocation4]  }
   0x8   :  { %10 = dma.hbm_to_smem %s1728_s0, 16, %s1216_s22, [#allocation3] }
   0x9   :  { %1150 = dma.done.wait [#allocation3], 16 }
   0xa   :  { %1151 = vsyncadd [#allocation3], 4294967280 }
   0xb   :  { %12 = sfence }
   0xc   :  { %13 = vsyncpa [#allocation6], 0 }
   0xd   :  { %15 = vsyncpa [#allocation6 + $0x1], 0 }
   0xe   :  { %16 = vsyncpa [#allocation9], 0 }
   0xf   :  { %18 = vsyncpa [#allocation9 + $0x1], 0 }
  0x10   :  { %19 = vsyncpa [#allocation7], 0 }
  0x11   :  { %21 = vsyncpa [#allocation7 + $0x1], 0  ;;  %s1264_s25 = smov 0   ;;  %s1266_s26 = smov 0  }
  0x12   :  { %s1268_s27 = smov 0   ;;  %s1270_s28 = smov 0  }
  0x13   :  { %s1272_s29 = smov 0   ;;  %s1274_s0 = smov 0  }
  0x14   :  { %s1276_s30 = smov 0   ;;  %s1278_s5 = smov 0  }
  0x15   :  { %s1280_s6 = smov 0   ;;  %s1282_s7 = smov 0  }
  0x16   :  { %s1284_s8 = smov 0   ;;  %s1286_s9 = smov 0  }
  0x17 LB: > { %1747 = sst [smem:[#allocation21_spill]] %s1190_s0  ;;  %s1323_s10 = sadd.s32 4294967295, %s1214_s9   ;;  %s1214_s9 = sphi %s1286_s9, %s27_s9   ;;  %s1210_s8 = sphi %s1284_s8, %s1793_s8   ;;  %s1206_s7 = sphi %s1282_s7, %s1792_s7   ;;  %s1202_s6 = sphi %s1280_s6, %s1784_s6   ;;  %s1198_s5 = sphi %s1278_s5, %s1791_s5   ;;  %s1194_s30 = sphi %s1276_s30, %s1790_s30   ;;  %s1190_s0 = sphi %s1274_s0, %s1782_s0   ;;  %s1186_s29 = sphi %s1272_s29, %s1789_s29   ;;  %s1182_s28 = sphi %s1270_s28, %s1788_s28   ;;  %s1178_s27 = sphi %s1268_s27, %s1787_s27   ;;  %s1174_s26 = sphi %s1266_s26, %s1786_s26   ;;  %s1170_s25 = sphi %s1264_s25, %s1785_s25  }
  0x18   : > { %1748 = sst [smem:[#allocation22_spill]] %s1194_s30  ;;  %s39_s11 = sadd.s32 1, %s1210_s8 }
  0x19   : > { %1749 = sst [smem:[#allocation23_spill]] %s1202_s6  ;;  %p41_p3 = scmp.ge.s32.totalorder %s39_s11, 3 }
  0x1a   : > { %p1735_p4 = scmp.eq.s32.totalorder %s1214_s9, 0  ;;  %p1734_p5 = scmp.eq.s32.totalorder %s1323_s10, 0 }
  0x1b   : > { %s69_s12 = sld [smem:[#allocation4 + %s1210_s8]]  ;;  %s1795_s11 = smov (%p41_p3, %s39_s11), 0 }
  0x1c   : > { %s76_s13 = sadd.s32 1, %s1190_s0  ;;  %p83_p6 = scmp.ne.s32.totalorder %s1190_s0, %s1186_s29 }
  0x1d   : > { %s70_s14 = sld [smem:[#allocation4 + %s1795_s11]]  ;;  %p89_p7 = scmp.ne.s32.totalorder %s1186_s29, %s1182_s28 }
  0x1e   : > { %p1338_p8 = por %p83_p6, %p1735_p4  ;;  %p1733_p10 = scmp.lt.s32.totalorder %s1214_s9, 3 }
  0x1f   : > { %p1344_p9 = por %p89_p7, %p1734_p5  ;;  %s190_s17 = sand.u32 1, %s1214_s9  }
  0x20   : > { %s192_s18 = sand.u32 1, %s1190_s0   ;;  %p1369_p12 = pnand %p1733_p10, %p1338_p8 }
  0x21   : > { %s1751_s16 = scalar_select %p1344_p9, 1, 0 }
  0x22   : > { %s711_s19 = sshll.u32 %s192_s18, 8  ;;  %p717_p13 = scmp.ge.s32.totalorder %s1214_s9, 1 }
  0x23   : > { %s71_s20 = ssub.s32 %s69_s12, %s70_s14  ;;  %s194_s21 = scalar_lea.vmem [#allocation8], %s711_s19 }
  0x24   : > { %p74_p11 = scmp.eq.s32.totalorder %s71_s20, 0  ;;  %s204_s22 = sshll.u32 %s194_s21, 4  ;;  %s1363_s22 = int_to_ptr.vmem [resolvable:$true] %s204_s22 }
  0x25   : > { %s832_s23 = scalar_select %p1338_p8, [#allocation4], [#allocation12] }
  0x26   : > { %s1354_s24 = scalar_select %p74_p11, %s1190_s0, %s76_s13  }
  0x27   : > { %s833_s28 = scalar_select %p1338_p8, %s1210_s8, 0 }
  0x28   : > { %1752 = sst [smem:[#allocation24_spill]] %s1354_s24  ;;  %s1797_s23 = smov (!%p1733_p10, %s832_s23), [#allocation14] }
  0x29   : > { %s1799_s28 = smov (!%p1733_p10, %s833_s28), 0  ;;  %p236_p0 = scmp.lt.s32.totalorder %s1214_s9, 4 }
  0x2a   : > { %s195_s14 = sld [smem:[%s1797_s23 + %s1799_s28]]  ;;  %s705_s15 = sadd.s32 4294967294, %s1214_s9  }
  0x2b   : > { %p1375_p1 = pnand %p717_p13, %p236_p0  ;;  %s1755_s2 = sld [smem:[#allocation27_spill]] }
  0x2c   : > { %s1385_s24 = scalar_lea.sflag [#allocation9], %s190_s17  ;;  %p986_p3 = pneg %p1369_p12 }
  0x30   : > { %s728_s18 = sshll.u32 %s195_s14, 12 }
  0x31   : > { %s1382_s21 = scalar_lea.hbm %s1755_s2, %s728_s18  ;;  %s989_s18 = scalar_lea.hbm %s1755_s2, 8192 }
  0x32   : > { %s984_s23 = scalar_lea.hbm %s1382_s21, 4096  ;;  %p990_p8 = scmp.lt.u32.totalorder %s1382_s21, %s1755_s2 }
  0x33   : > { %p985_p2 = scmp.ne.s32.totalorder %s1382_s21, %s984_s23  ;;  %p991_p11 = scmp.lt.u32.totalorder %s989_s18, %s984_s23 }
  0x34   : > { %p993_p0 = scmp.lt.u32.totalorder %s984_s23, %s1382_s21 }
  0x35   : > { %p987_p6 = pnand %p986_p3, %p985_p2  ;;  %p992_p13 = por %p991_p11, %p990_p8 }
  0x37   : > { %p988_p7 = pneg %p987_p6  ;;  %p994_p10 = por %p993_p0, %p992_p13 }
  0x39   : > { %p995_p5 = pnand %p994_p10, %p988_p7 }
  0x3b   : > { %998 = shalt.err (!%p995_p5)
}
  0x3c   : > { %s999_s17 = scalar_lea.vmem %s1363_s22, 4096  ;;  %s1217_s28 = smov [#allocation8]  }
  0x3d   : > { %p1000_p2 = scmp.ne.s32.totalorder %s1363_s22, %s999_s17  ;;  %s1004_s14 = sshll.u32 %s1217_s28, 4  ;;  %s1005_s14 = int_to_ptr.vmem [resolvable:$false] %s1004_s14 }
  0x3e   : > { %s1006_s19 = scalar_lea.vmem %s1005_s14, 8192  ;;  %p1007_p9 = scmp.lt.s32.totalorder %s1363_s22, %s1005_s14 }
  0x3f   : > { %p1002_p6 = pnand %p1000_p2, %p986_p3  ;;  %p1008_p8 = scmp.lt.s32.totalorder %s1006_s19, %s999_s17 }
  0x41   : > { %p1003_p4 = pneg %p1002_p6  ;;  %p1009_p11 = por %p1008_p8, %p1007_p9 }
  0x43   : > { %p1010_p13 = pnand %p1009_p11, %p1003_p4 }
  0x45   : > { %1013 = shalt.err (!%p1010_p13)
}
  0x46   : > { %s1737_s23 = smov 128   ;;  %s1738_s18 = smov 8  }
  0x47   : > { %851 = dma.hbm_to_vmem [thread:$0]  (!%p1369_p12), %s1382_s21, 4096, %s1363_s22, %s1385_s24, %s1737_s23, %s1737_s23, %s1738_s18  }
  0x48   : > { %s43_s20 = ssub.s32 %s1210_s8, %s1795_s11  ;;  %s46_s17 = sadd.s32 1, %s1202_s6 }
  0x49   : > { %p44_p4 = scmp.eq.s32.totalorder %s43_s20, 0  ;;  %p53_p5 = scmp.ne.s32.totalorder %s1202_s6, %s1198_s5 }
  0x4a   : > { %p59_p9 = scmp.ne.s32.totalorder %s1198_s5, %s1194_s30  ;;  %p143_p10 = scmp.eq.s32.totalorder %s1323_s10, 2 }
  0x4b   : > { %s1425_s28 = scalar_select %p44_p4, %s1202_s6, %s46_s17  }
  0x4c   : > { %p1757_p3 = scmp.eq.s32.totalorder %s1214_s9, 0  ;;  %p1758_p0 = scmp.eq.s32.totalorder %s1323_s10, 0 }
  0x4d   : > { %1756 = sst [smem:[#allocation25_spill]] %s1425_s28  ;;  %p1435_p6 = por %p143_p10, %p53_p5 }
  0x4e   : > { %p55_p7 = por %p1757_p3, %p53_p5  ;;  %p1431_p2 = por %p1758_p0, %p59_p9 }
  0x4f   : > { %s1760_s12 = scalar_select %p1435_p6, 1, 0 }
  0x50   : > { %s1759_s14 = scalar_select %p1431_p2, 1, 0 }
  0x51   : > { %p149_p12 = scmp.eq.s32.totalorder %s705_s15, 2  ;;  %s169_s22 = sand.u32 1, %s1202_s6  }
  0x52   : > { %s727_s21 = sshll.u32 %s1210_s8, 8  ;;  %s708_s20 = sshll.u32 %s169_s22, 4 }
  0x53   : > { %p1443_p8 = por %p149_p12, %p59_p9  ;;  %s1450_s18 = scalar_lea.hbm %s1729_s1, %s727_s21 }
  0x54   : > { %p1763_p11 = scmp.lt.s32.totalorder %s1214_s9, 3  ;;  %s173_s15 = scalar_lea.vmem [#allocation5], %s708_s20 }
  0x55   : > { %s1761_s19 = scalar_select %p1443_p8, 1, 0 }
  0x56   : > { %p1454_p13 = pnand %p1763_p11, %p55_p7  ;;  %s180_s28 = sshll.u32 %s173_s15, 4  ;;  %s1458_s28 = int_to_ptr.vmem [resolvable:$true] %s180_s28 }
  0x57   : > { %1762 = sst [smem:[#allocation26_spill]] %s1761_s19  ;;  %s1460_s6 = scalar_lea.sflag [#allocation6], %s169_s22 }
  0x58   : > { %s1014_s23 = scalar_lea.hbm %s1450_s18, 256  ;;  %p1016_p5 = pneg %p1454_p13 }
  0x59   : > { %p1015_p4 = scmp.ne.s32.totalorder %s1450_s18, %s1014_s23  ;;  %s1019_s0 = scalar_lea.hbm %s1729_s1, 768 }
  0x5a   : > { %p1020_p3 = scmp.lt.u32.totalorder %s1450_s18, %s1729_s1  ;;  %p1021_p7 = scmp.lt.u32.totalorder %s1019_s0, %s1014_s23 }
  0x5b   : > { %p1017_p9 = pnand %p1016_p5, %p1015_p4  ;;  %p1023_p12 = scmp.lt.u32.totalorder %s1014_s23, %s1450_s18 }
  0x5c   : > { %p1022_p0 = por %p1021_p7, %p1020_p3 }
  0x5d   : > { %p1018_p10 = pneg %p1017_p9 }
  0x5e   : > { %p1024_p11 = por %p1023_p12, %p1022_p0 }
  0x60   : > { %p1025_p8 = pnand %p1024_p11, %p1018_p10 }
  0x62   : > { %1028 = shalt.err (!%p1025_p8)
}
  0x63   : > { %s1029_s22 = scalar_lea.vmem %s1458_s28, 256  ;;  %s1220_s20 = smov [#allocation5]  }
  0x64   : > { %p1030_p4 = scmp.ne.s32.totalorder %s1458_s28, %s1029_s22  ;;  %s1034_s15 = sshll.u32 %s1220_s20, 4  ;;  %s1035_s15 = int_to_ptr.vmem [resolvable:$false] %s1034_s15 }
  0x65   : > { %s1036_s30 = scalar_lea.vmem %s1035_s15, 512  ;;  %p1037_p2 = scmp.lt.s32.totalorder %s1458_s28, %s1035_s15 }
  0x66   : > { %p1032_p9 = pnand %p1030_p4, %p1016_p5  ;;  %p1038_p3 = scmp.lt.s32.totalorder %s1036_s30, %s1029_s22 }
  0x68   : > { %p1033_p6 = pneg %p1032_p9  ;;  %p1039_p7 = por %p1038_p3, %p1037_p2 }
  0x6a   : > { %p1040_p0 = pnand %p1039_p7, %p1033_p6 }
  0x6c   : > { %1043 = shalt.err (!%p1040_p0)
}
  0x6d   : > { %s1765_s0 = smov 8   ;;  %s1766_s19 = smov 128  }
  0x6e   : > { %846 = dma.hbm_to_vmem [thread:$0]  (!%p1454_p13), %s1450_s18, 256, %s1458_s28, %s1460_s6, %s1766_s19, %s1766_s19, %s1765_s0  }
  0x6f   : > { %s99_s2 = sld [smem:[#allocation4 + %s1210_s8]]  ;;  %p113_p2 = scmp.ne.s32.totalorder %s1178_s27, %s1174_s26 }
  0x70   : > { %s100_s23 = sld [smem:[#allocation4 + %s1795_s11]]  ;;  %p119_p6 = scmp.ne.s32.totalorder %s1174_s26, %s1170_s25 }
  0x71   : > { %p1767_p8 = scmp.eq.s32.totalorder %s1323_s10, 0  ;;  %s216_s17 = sand.u32 1, %s1178_s27  }
  0x72   : > { %p1769_p10 = scmp.eq.s32.totalorder %s1214_s9, 0  ;;  %s106_s22 = sadd.s32 1, %s1178_s27 }
  0x73   : > { %p1499_p5 = por %p119_p6, %p1767_p8  ;;  %s714_s15 = sshll.u32 %s216_s17, 8 }
  0x74   : > { %p115_p12 = por %p113_p2, %p1769_p10  ;;  %p1770_p4 = scmp.lt.s32.totalorder %s1214_s9, 3 }
  0x75   : > { %s1768_s21 = scalar_select %p1499_p5, 1, 0 }
  0x76   : > { %s101_s20 = ssub.s32 %s99_s2, %s100_s23  ;;  %p1509_p13 = pnand %p1770_p4, %p115_p12 }
  0x77   : > { %p104_p11 = scmp.eq.s32.totalorder %s101_s20, 0  ;;  %p1772_p9 = pmov %p1770_p4 }
  0x78   : > { %s835_s25 = scalar_select %p115_p12, [#allocation4], [#allocation13] }
  0x79   : > { %s1514_s18 = scalar_select %p104_p11, %s1178_s27, %s106_s22  }
  0x7a   : > { %s836_s28 = scalar_select %p115_p12, %s1210_s8, 0 }
  0x7b   : > { %s1801_s25 = smov (!%p1772_p9, %s835_s25), [#allocation15]  ;;  %p1773_p3 = pmov %p1770_p4 }
  0x7c   : > { %s218_s0 = scalar_lea.vmem [#allocation10], %s714_s15  ;;  %p1046_p0 = pneg %p1509_p13 }
  0x7d   : > { %s1803_s28 = smov (!%p1773_p3, %s836_s28), 0  ;;  %s228_s19 = sshll.u32 %s218_s0, 4  ;;  %s1521_s19 = int_to_ptr.vmem [resolvable:$true] %s228_s19 }
  0x7e   : > { %s219_s30 = sld [smem:[%s1801_s25 + %s1803_s28]]  ;;  %s1049_s28 = scalar_lea.hbm %s1731_s3, 8192 }
  0x84   : > { %s729_s2 = sshll.u32 %s219_s30, 12 }
  0x85   : > { %s1526_s20 = scalar_lea.hbm %s1731_s3, %s729_s2 }
  0x86   : > { %s1044_s22 = scalar_lea.hbm %s1526_s20, 4096  ;;  %p1050_p8 = scmp.lt.u32.totalorder %s1526_s20, %s1731_s3 }
  0x87   : > { %p1045_p7 = scmp.ne.s32.totalorder %s1526_s20, %s1044_s22  ;;  %p1051_p10 = scmp.lt.u32.totalorder %s1049_s28, %s1044_s22 }
  0x88   : > { %p1053_p11 = scmp.lt.u32.totalorder %s1044_s22, %s1526_s20 }
  0x89   : > { %p1047_p2 = pnand %p1046_p0, %p1045_p7  ;;  %p1052_p12 = por %p1051_p10, %p1050_p8 }
  0x8b   : > { %p1048_p6 = pneg %p1047_p2  ;;  %p1054_p4 = por %p1053_p11, %p1052_p12 }
  0x8d   : > { %p1055_p9 = pnand %p1054_p4, %p1048_p6 }
  0x8f   : > { %1058 = shalt.err (!%p1055_p9)
}
  0x90   : > { %s1059_s2 = scalar_lea.vmem %s1521_s19, 4096  ;;  %s1221_s23 = smov [#allocation10]  }
  0x91   : > { %p1060_p3 = scmp.ne.s32.totalorder %s1521_s19, %s1059_s2  ;;  %s1064_s17 = sshll.u32 %s1221_s23, 4  ;;  %s1065_s17 = int_to_ptr.vmem [resolvable:$false] %s1064_s17 }
  0x92   : > { %s1066_s15 = scalar_lea.vmem %s1065_s17, 8192  ;;  %p1067_p5 = scmp.lt.s32.totalorder %s1521_s19, %s1065_s17 }
  0x93   : > { %p1062_p7 = pnand %p1060_p3, %p1046_p0  ;;  %p1068_p8 = scmp.lt.s32.totalorder %s1066_s15, %s1059_s2 }
  0x95   : > { %p1063_p2 = pneg %p1062_p7  ;;  %p1069_p10 = por %p1068_p8, %p1067_p5 }
  0x97   : > { %p1070_p12 = pnand %p1069_p10, %p1063_p2 }
  0x99   : > { %1073 = shalt.err (!%p1070_p12)
}
  0x9a   : > { %s1222_s22 = smov 256   ;;  %s1223_s25 = smov 16  }
  0x9b   : > { %856 = dma.hbm_to_vmem [thread:$0]  (!%p1509_p13), %s1526_s20, 4096, %s1521_s19, %s1385_s24, %s1222_s22, %s1222_s22, %s1223_s25  }
  0x9c   : > { %240 = sbr.rel (%p1375_p1) target bundleno = 702 (0x2be), region = 32  ;;  %s1557_s28 = sand.u32 (!%p1375_p1), 1, %s1198_s5  }
  0x9d   : > { %s718_s30 = sshll.u32 (!%p1375_p1), %s1557_s28, 4  ;;  %s243_s0 = scalar_lea.sflag (!%p1375_p1), [#allocation6], %s1557_s28 }
  0x9e   : > { %s1563_s2 = scalar_lea.vmem (!%p1375_p1), [#allocation5], %s718_s30  ;;  %p1774_p5 = scmp.ne.s32.totalorder (!%p1375_p1), %s1759_s14, 0 }
  0xa3   : > { %1153 = dma.done.wait (%p1774_p5), %s243_s0, 256  }
  0xa4   : > { %1155 = vsyncadd (%p1774_p5), %s243_s0, 4294967040  ;;  %s251_s24 = sand.u32 1, %s1323_s10   ;;  %s253_s13 = sand.u32 1, %s1186_s29  }
  0xa5   : > { %s719_s6 = sshll.u32 %s253_s13, 8  ;;  %s252_s19 = scalar_lea.sflag [#allocation9], %s251_s24 }
  0xa6   : > { %s1571_s20 = scalar_lea.vmem [#allocation8], %s719_s6  ;;  %p1775_p1 = scmp.ne.s32.totalorder %s1751_s16, 0 }
  0xa8   : > { %1157 = dma.done.wait (%p1775_p1), %s252_s19, 4096  }
  0xa9   : > { %1159 = vsyncadd (%p1775_p1), %s252_s19, 4294963200  ;;  %s262_s23 = sand.u32 1, %s1174_s26   ;;  %p1776_p13 = scmp.ne.s32.totalorder %s1768_s21, 0 }
  0xaa   : > { %s720_s17 = sshll.u32 %s262_s23, 8 }
  0xab   : > { %s1578_s14 = scalar_lea.vmem [#allocation10], %s720_s17 }
  0xac   : > { %1161 = dma.done.wait (%p1776_p13), %s252_s19, 4096  }
  0xad   : > { %1163 = vsyncadd (%p1776_p13), %s252_s19, 4294963200  ;;  %v327_v0 = vld [vmem:[%s1571_s20 + $0x80] sm:$0xff]  ;;  %v328_v1 = vld [vmem:[%s1571_s20 + $0x88] sm:$0xff]  ;;  %s296_s10 = scalar_lea.vmem [#allocation11], %s718_s30  ;;  %s730_s21 = sshll.u32 %s1206_s7, 8 }
  0xae   : > { %v311_v2 = vld [vmem:[%s1571_s20] sm:$0xff]  ;;  %v767_v3 = vpack.c.bf16 %v328_v1, %v327_v0  ;;  %v312_v4 = vld [vmem:[%s1571_s20 + $0x8] sm:$0xff]  ;;  %v329_v5 = vld [vmem:[%s1571_s20 + $0x90] sm:$0xff]  ;;  %s574_s16 = sshll.u32 %s296_s10, 4  ;;  %s1662_s25 = scalar_lea.hbm %s1732_s4, %s730_s21  ;;  %s1657_s16 = int_to_ptr.vmem [resolvable:$true] %s574_s16 }
  0xaf   : > { %v330_v6 = vld [vmem:[%s1571_s20 + $0x98] sm:$0xff]  ;;  %v769_v7 = vpack.c.bf16 %v312_v4, %v311_v2  ;;  %v313_v9 = vld [vmem:[%s1571_s20 + $0x10] sm:$0xff]  ;;  %v331_v11 = vld [vmem:[%s1571_s20 + $0xa0] sm:$0xff]  ;;  %s561_s0 = scalar_lea.sflag [#allocation7], %s1557_s28  ;;  %s1074_s30 = scalar_lea.vmem %s1657_s16, 256 }
  0xb0   : > { %v771_v8 = vpack.c.bf16 %v330_v6, %v329_v5  ;;  %768 = vmatprep.subr.bf16.mxu0 %v767_v3  ;;  %v314_v10 = vld [vmem:[%s1571_s20 + $0x18] sm:$0xff]  ;;  %v332_v12 = vld [vmem:[%s1571_s20 + $0xa8] sm:$0xff]  ;;  %v1595_v15 = vld [vmem:[%s1563_s2] sm:$0xff]  ;;  %p1075_p0 = scmp.ne.s32.totalorder %s1657_s16, %s1074_s30  ;;  %p1777_p6 = scmp.ne.s32.totalorder %s1760_s12, 0 }
  0xb1   : > { %770 = vmatpush3.bf16.xpose.msra.mxu0 %v769_v7  ;;  %v773_v13 = vpack.c.bf16 %v314_v10, %v313_v9  ;;  %v775_v14 = vpack.c.bf16 %v332_v12, %v331_v11  ;;  %763 = vmatprep.mubr.f32.mxu0 %v1595_v15  ;;  %v344_v16 = vld [vmem:[%s1578_s14 + $0x8] sm:$0xff]  ;;  %v346_v17 = vld [vmem:[%s1578_s14 + $0x18] sm:$0xff]  ;;  %v343_v19 = vld [vmem:[%s1578_s14] sm:$0xff]  ;;  %s1224_s7 = smov [#allocation11]  }
  0xb2   : > { %772 = vmatprep.subr.bf16.mxu0 %v771_v8  ;;  %v799_v18 = vpack.c.bf16 %v346_v17, %v344_v16  ;;  %v345_v20 = vld [vmem:[%s1578_s14 + $0x10] sm:$0xff]  ;;  %v348_v21 = vld [vmem:[%s1578_s14 + $0x28] sm:$0xff]  ;;  %v315_v22 = vld [vmem:[%s1571_s20 + $0x20] sm:$0xff]  ;;  %p1076_p11 = pnand %p1075_p0, %p1777_p6 }
  0xb3   : > { %v316_v23 = vld [vmem:[%s1571_s20 + $0x28] sm:$0xff]  ;;  %v801_v24 = vpack.c.bf16 %v345_v20, %v343_v19  ;;  %v350_v25 = vld [vmem:[%s1578_s14 + $0x38] sm:$0xff]  ;;  %v333_v26 = vld [vmem:[%s1571_s20 + $0xb0] sm:$0xff] }
  0xb4   : > { %v334_v27 = vld [vmem:[%s1571_s20 + $0xb8] sm:$0xff]  ;;  %800 = vmatprep.subr.bf16.mxu1 %v799_v18  ;;  %v803_v28 = vpack.c.bf16 %v350_v25, %v348_v21  ;;  %v777_v29 = vpack.c.bf16 %v316_v23, %v315_v22  ;;  %v347_v30 = vld [vmem:[%s1578_s14 + $0x20] sm:$0xff]  ;;  %v349_v31 = vld [vmem:[%s1578_s14 + $0x30] sm:$0xff]  ;;  %p1077_p4 = pneg %p1076_p11 }
  0xb5   : > { %802 = vmatpush1.bf16.xpose.msra.mxu1 %v801_v24  ;;  %v779_v32 = vpack.c.bf16 %v334_v27, %v333_v26  ;;  %v352_v33 = vld [vmem:[%s1578_s14 + $0x48] sm:$0xff]  ;;  %v354_v34 = vld [vmem:[%s1578_s14 + $0x58] sm:$0xff]  ;;  %v805_v35 = vpack.c.bf16 %v349_v31, %v347_v30  ;;  %v317_v37 = vld [vmem:[%s1571_s20 + $0x30] sm:$0xff] }
  0xb6   : > { %804 = vmatprep.subr.bf16.mxu1 %v803_v28  ;;  %v807_v36 = vpack.c.bf16 %v354_v34, %v352_v33  ;;  %v318_v38 = vld [vmem:[%s1571_s20 + $0x38] sm:$0xff]  ;;  %v335_v39 = vld [vmem:[%s1571_s20 + $0xc0] sm:$0xff]  ;;  %v336_v40 = vld [vmem:[%s1571_s20 + $0xc8] sm:$0xff] }
  0xb7   : > { %v781_v41 = vpack.c.bf16 %v318_v38, %v317_v37  ;;  %v351_v42 = vld [vmem:[%s1578_s14 + $0x40] sm:$0xff]  ;;  %v353_v43 = vld [vmem:[%s1578_s14 + $0x50] sm:$0xff]  ;;  %v783_v44 = vpack.c.bf16 %v336_v40, %v335_v39  ;;  %v356_v45 = vld [vmem:[%s1578_s14 + $0x68] sm:$0xff] }
  0xb8   : > { %v358_v46 = vld [vmem:[%s1578_s14 + $0x78] sm:$0xff]  ;;  %v809_v47 = vpack.c.bf16 %v353_v43, %v351_v42  ;;  %v319_v49 = vld [vmem:[%s1571_s20 + $0x40] sm:$0xff]  ;;  %v320_v50 = vld [vmem:[%s1571_s20 + $0x48] sm:$0xff] }
  0xb9   : > { %774 = vmatpush3.bf16.xpose.msra.mxu0 %v773_v13  ;;  %v811_v48 = vpack.c.bf16 %v358_v46, %v356_v45  ;;  %v337_v51 = vld [vmem:[%s1571_s20 + $0xd0] sm:$0xff]  ;;  %v338_v52 = vld [vmem:[%s1571_s20 + $0xd8] sm:$0xff]  ;;  %v785_v53 = vpack.c.bf16 %v320_v50, %v319_v49  ;;  %v355_v54 = vld [vmem:[%s1578_s14 + $0x60] sm:$0xff] }
  0xba   : > { %776 = vmatprep.subr.bf16.mxu0 %v775_v14  ;;  %v357_v55 = vld [vmem:[%s1578_s14 + $0x70] sm:$0xff]  ;;  %v787_v56 = vpack.c.bf16 %v338_v52, %v337_v51  ;;  %v360_v57 = vld [vmem:[%s1578_s14 + $0x88] sm:$0xff]  ;;  %v362_v58 = vld [vmem:[%s1578_s14 + $0x98] sm:$0xff] }
  0xbb   : > { %v813_v59 = vpack.c.bf16 %v357_v55, %v355_v54  ;;  %v815_v60 = vpack.c.bf16 %v362_v58, %v360_v57  ;;  %v321_v61 = vld [vmem:[%s1571_s20 + $0x50] sm:$0xff]  ;;  %v322_v62 = vld [vmem:[%s1571_s20 + $0x58] sm:$0xff]  ;;  %v339_v63 = vld [vmem:[%s1571_s20 + $0xe0] sm:$0xff] }
  0xbc   : > { %v340_v0 = vld [vmem:[%s1571_s20 + $0xe8] sm:$0xff]  ;;  %v789_v1 = vpack.c.bf16 %v322_v62, %v321_v61  ;;  %v359_v2 = vld [vmem:[%s1578_s14 + $0x80] sm:$0xff]  ;;  %v361_v3 = vld [vmem:[%s1578_s14 + $0x90] sm:$0xff] }
  0xbd   : > { %806 = vmatpush1.bf16.xpose.msra.mxu1 %v805_v35  ;;  %v791_v4 = vpack.c.bf16 %v340_v0, %v339_v63  ;;  %v364_v5 = vld [vmem:[%s1578_s14 + $0xa8] sm:$0xff]  ;;  %v366_v6 = vld [vmem:[%s1578_s14 + $0xb8] sm:$0xff]  ;;  %v817_v7 = vpack.c.bf16 %v361_v3, %v359_v2  ;;  %v323_v9 = vld [vmem:[%s1571_s20 + $0x60] sm:$0xff] }
  0xbe   : > { %808 = vmatprep.subr.bf16.mxu1 %v807_v36  ;;  %v819_v8 = vpack.c.bf16 %v366_v6, %v364_v5  ;;  %v324_v10 = vld [vmem:[%s1571_s20 + $0x68] sm:$0xff]  ;;  %v341_v11 = vld [vmem:[%s1571_s20 + $0xf0] sm:$0xff]  ;;  %v342_v12 = vld [vmem:[%s1571_s20 + $0xf8] sm:$0xff] }
  0xbf   : > { %v793_v13 = vpack.c.bf16 %v324_v10, %v323_v9  ;;  %v363_v14 = vld [vmem:[%s1578_s14 + $0xa0] sm:$0xff]  ;;  %v365_v16 = vld [vmem:[%s1578_s14 + $0xb0] sm:$0xff]  ;;  %v795_v17 = vpack.c.bf16 %v342_v12, %v341_v11  ;;  %v326_v20 = vld [vmem:[%s1571_s20 + $0x78] sm:$0xff] }
  0xc0   : > { %v821_v18 = vpack.c.bf16 %v365_v16, %v363_v14  ;;  %v325_v19 = vld [vmem:[%s1571_s20 + $0x70] sm:$0xff]  ;;  %v310_v22 = vld [vmem:[%s1563_s2 + $0x8] sm:$0xff]  ;;  %v367_v26 = vld [vmem:[%s1578_s14 + $0xc0] sm:$0xff]  ;;  %s1078_s2 = sshll.u32 %s1224_s7, 4  ;;  %s1079_s2 = int_to_ptr.vmem [resolvable:$false] %s1078_s2 }
  0xc1   : > { %778 = vmatpush3.bf16.xpose.msra.mxu0 %v777_v29  ;;  %v797_v21 = vpack.c.bf16 %v326_v20, %v325_v19  ;;  %v368_v23 = vld [vmem:[%s1578_s14 + $0xc8] sm:$0xff]  ;;  %v370_v24 = vld [vmem:[%s1578_s14 + $0xd8] sm:$0xff]  ;;  %v369_v27 = vld [vmem:[%s1578_s14 + $0xd0] sm:$0xff]  ;;  %s1080_s24 = scalar_lea.vmem %s1079_s2, 512  ;;  %p1081_p9 = scmp.lt.s32.totalorder %s1657_s16, %s1079_s2 }
  0xc2   : > { %780 = vmatprep.subr.bf16.mxu0 %v779_v32  ;;  %v823_v25 = vpack.c.bf16 %v370_v24, %v368_v23  ;;  %v825_v28 = vpack.c.bf16 %v369_v27, %v367_v26  ;;  %v372_v29 = vld [vmem:[%s1578_s14 + $0xe8] sm:$0xff]  ;;  %v374_v30 = vld [vmem:[%s1578_s14 + $0xf8] sm:$0xff]  ;;  %v371_v32 = vld [vmem:[%s1578_s14 + $0xe0] sm:$0xff]  ;;  %p1082_p3 = scmp.lt.s32.totalorder %s1080_s24, %s1074_s30 }
  0xc3   : > { %v827_v31 = vpack.c.bf16 %v374_v30, %v372_v29  ;;  %v373_v33 = vld [vmem:[%s1578_s14 + $0xf0] sm:$0xff] }
  0xc4   : > { %v829_v34 = vpack.c.bf16 %v373_v33, %v371_v32  ;;  %p1083_p7 = por %p1082_p3, %p1081_p9 }
  0xc5   : > { %810 = vmatpush1.bf16.xpose.msra.mxu1 %v809_v47 }
  0xc6   : > { %812 = vmatprep.subr.bf16.mxu1 %v811_v48  ;;  %p1084_p2 = pnand %p1083_p7, %p1077_p4 }
  0xc9   : > { %782 = vmatpush3.bf16.xpose.msra.mxu0 %v781_v41 }
  0xca   : > { %784 = vmatprep.subr.bf16.mxu0 %v783_v44 }
  0xcd   : > { %814 = vmatpush1.bf16.xpose.msra.mxu1 %v813_v59 }
  0xce   : > { %816 = vmatprep.subr.bf16.mxu1 %v815_v60 }
  0xd1   : > { %786 = vmatpush3.bf16.xpose.msra.mxu0 %v785_v53 }
  0xd2   : > { %788 = vmatprep.subr.bf16.mxu0 %v787_v56 }
  0xd5   : > { %818 = vmatpush1.bf16.xpose.msra.mxu1 %v817_v7 }
  0xd6   : > { %820 = vmatprep.subr.bf16.mxu1 %v819_v8 }
  0xd9   : > { %790 = vmatpush3.bf16.xpose.msra.mxu0 %v789_v1 }
  0xda   : > { %792 = vmatprep.subr.bf16.mxu0 %v791_v4 }
  0xdd   : > { %822 = vmatpush1.bf16.xpose.msra.mxu1 %v821_v18 }
  0xde   : > { %824 = vmatprep.subr.bf16.mxu1 %v823_v25 }
  0xe1   : > { %794 = vmatpush3.bf16.xpose.msra.mxu0 %v793_v13 }
  0xe2   : > { %796 = vmatprep.subr.bf16.mxu0 %v795_v17 }
  0xe5   : > { %826 = vmatpush1.bf16.xpose.msra.mxu1 %v825_v28 }
  0xe6   : > { %828 = vmatprep.subr.bf16.mxu1 %v827_v31 }
  0xe9   : > { %798 = vmatpush3.bf16.xpose.msra.mxu0 %v797_v21 }
  0xed   : > { %830 = vmatpush1.bf16.xpose.msra.mxu1 %v829_v34 }
  0xf0   : > { %764 = vmatmul.mubr.f32.vlgmr.msra.gmra.mrb[0].mxu0 %v1595_v15 }
  0xf1   : > { %765 = vmatprep.mubr.f32.mxu0 %v310_v22 }
  0xf4   : > { %766 = vmatmul.mubr.f32.gmra.mrb[2].mxu0 %v310_v22 }
 0x1c3   : > { %v441_v35 = vpop.f32.mrb[0].mxu0 }
 0x1c4   : > { %v456_v15 = vmul.f32 0.70710677, %v441_v35  ;;  %v443_v36 = vpop.f32.mrb[1].mxu0  ;;  %v452_v47 = vmul.f32 0.5, %v441_v35 }
 0x1c5   : > { %v457_v37 = vmul.f32 0.70710677, %v443_v36  ;;  %v453_v45 = vmul.f32 0.5, %v443_v36 }
 0x1c6   : > { %966 = verf.f32 %v456_v15 }
 0x1c7   : > { %968 = verf.f32 %v457_v37  ;;  %v447_v38 = vpop.f32.mrb[2].mxu0 }
 0x1c8   : > { %v458_v39 = vmul.f32 0.70710677, %v447_v38  ;;  %v449_v40 = vpop.f32.mrb[3].mxu0  ;;  %v454_v55 = vmul.f32 0.5, %v447_v38 }
 0x1c9   : > { %v459_v41 = vmul.f32 0.70710677, %v449_v40  ;;  %v455_v53 = vmul.f32 0.5, %v449_v40 }
 0x1ca   : > { %970 = verf.f32 %v458_v39 }
 0x1cb   : > { %972 = verf.f32 %v459_v41 }
 0x1d0   : > { %v967_v42 = vpop.eup %966 }
 0x1d1   : > { %v969_v43 = vpop.eup %968  ;;  %v464_v44 = vadd.f32 1.0, %v967_v42 }
 0x1d2   : > { %v465_v46 = vadd.f32 1.0, %v969_v43 }
 0x1d3   : > { %v468_v51 = vmul.f32 %v464_v44, %v452_v47 }
 0x1d4   : > { %v971_v48 = vpop.eup %970  ;;  %v469_v49 = vmul.f32 %v465_v46, %v453_v45 }
 0x1d5   : > { %v973_v50 = vpop.eup %972  ;;  %v466_v52 = vadd.f32 1.0, %v971_v48 }
 0x1d6   : > { %v467_v54 = vadd.f32 1.0, %v973_v50  ;;  %538 = vmatprep.mubr.f32.mxu1 %v469_v49 }
 0x1d7   : > { %539 = vmatmul.mubr.f32.vlgmr.msra.gmra.mrb[0].mxu1 %v468_v51  ;;  %v470_v57 = vmul.f32 %v466_v52, %v454_v55 }
 0x1d8   : > { %v471_v56 = vmul.f32 %v467_v54, %v455_v53 }
 0x1da   : > { %543 = vmatprep.mubr.f32.mxu1 %v471_v56 }
 0x1db   : > { %544 = vmatmul.mubr.f32.gmra.mrb[2].mxu1 %v470_v57 }
 0x2aa   : > { %v540_v58 = vpop.f32.mrb[0].mxu1 }
 0x2ab   : > { %558 = vst [vmem:[%s296_s10] sm:$0xff] %v540_v58  ;;  %v542_v59 = vpop.f32.mrb[1].mxu1 }
 0x2ae   : > { %v545_v60 = vpop.f32.mrb[2].mxu1 }
 0x2af   : > { %559 = vst [vmem:[%s296_s10 + $0x8] sm:$0xff] %v545_v60  ;;  %v547_v61 = vpop.f32.mrb[3].mxu1 }
 0x2b0   : > { %1087 = shalt.err (!%p1084_p2)
}
 0x2b1   : > { %s1088_s13 = scalar_lea.hbm %s1662_s25, 256  ;;  %s1092_s20 = scalar_lea.hbm %s1732_s4, 768 }
 0x2b2   : > { %p1089_p8 = scmp.ne.s32.totalorder %s1662_s25, %s1088_s13  ;;  %p1093_p5 = scmp.lt.u32.totalorder %s1662_s25, %s1732_s4 }
 0x2b3   : > { %p1094_p1 = scmp.lt.u32.totalorder %s1092_s20, %s1088_s13  ;;  %p1096_p0 = scmp.lt.u32.totalorder %s1088_s13, %s1662_s25 }
 0x2b4   : > { %p1090_p10 = pnand %p1089_p8, %p1777_p6 }
 0x2b5   : > { %p1095_p13 = por %p1094_p1, %p1093_p5 }
 0x2b6   : > { %p1091_p12 = pneg %p1090_p10 }
 0x2b7   : > { %p1097_p11 = por %p1096_p0, %p1095_p13 }
 0x2b9   : > { %p1098_p4 = pnand %p1097_p11, %p1091_p12 }
 0x2bb   : > { %1101 = shalt.err (!%p1098_p4)
}
 0x2bc   : > { %s1225_s14 = smov 128   ;;  %s1226_s10 = smov 8  }
 0x2bd   : > { %841 = dma.vmem_to_hbm [thread:$0]  (%p1777_p6), %s1657_s16, 256, %s1662_s25, %s561_s0, %s1225_s14, %s1225_s14, %s1226_s10  }
 0x2be PF: > { %s1778_s21 = sld [smem:[#allocation22_spill]]  ;;  %s1779_s15 = sld [smem:[#allocation26_spill]] }
 0x2bf   : > { %p862_p9 = scmp.ge.s32.totalorder %s1214_s9, 2 }
 0x2c4   : > { %s589_s22 = sand.u32 1, %s1778_s21   ;;  %p1780_p3 = scmp.ne.s32.totalorder %s1779_s15, 0 }
 0x2c5   : > { %s590_s30 = scalar_lea.sflag [#allocation7], %s589_s22 }
 0x2c6   : > { %p858_p7 = pnand %p862_p9, %p1780_p3 }
 0x2c8   : > { %1165 = dma.done.wait (!%p858_p7), %s590_s30, 256  }
 0x2c9   : > { %1167 = vsyncadd (!%p858_p7), %s590_s30, 4294967040  ;;  %s27_s9 = sadd.s32 1, %s1214_s9   ;;  %s1781_s12 = sld [smem:[#allocation21_spill]] }
 0x2ca   : > { %p24_p2 = scmp.ge.s32.totalorder %s27_s9, 5   ;;  %s1782_s0 = sld [smem:[#allocation24_spill]] }
 0x2cb   : > { %s1783_s16 = sld [smem:[#allocation23_spill]]  ;;  %s1784_s6 = sld [smem:[#allocation25_spill]] }
 0x2cc   : > { %s1785_s25 = smov %s1174_s26  ;;  %s1786_s26 = smov %s1178_s27 }
 0x2cd   : > { %s1787_s27 = smov %s1514_s18  ;;  %s1788_s28 = smov %s1186_s29 }
 0x2ce   : > { %s1790_s30 = smov %s1198_s5  ;;  %s1792_s7 = smov %s1210_s8 }
 0x2cf   : > { %s1789_s29 = smov %s1781_s12  ;;  %s1793_s8 = smov %s1795_s11 }
 0x2d0   :  { %26 = sbr.rel (!%p24_p2) target bundleno = 23 (0x17), region = 109 }
 0x2d1   : > { %s1791_s5 = smov %s1783_s16 }
 0x2d7   :  { %595 = vsyncpa [#allocation6], 1 }
 0x2d8   :  { %597 = vsyncpa [#allocation6 + $0x1], 1 }
 0x2d9   :  { %598 = vsyncpa [#allocation9], 1 }
 0x2da   :  { %600 = vsyncpa [#allocation9 + $0x1], 1 }
 0x2db   :  { %601 = vsyncpa [#allocation7], 1 }
 0x2dc   :  { %603 = vsyncpa [#allocation7 + $0x1], 1 }

</bundles_post_ra>
